<compile_context>
chip_gen: v7x
topology: tpu7x:2x2x1
jax: 0.10.0
libtpu: 0.0.40
codegen_flags: <defaults>
</compile_context>

<pallas_src>
import jax
import jax.numpy as jnp
from jax.experimental import pallas as pl
from jax.experimental.pallas import tpu as pltpu

_LANE = 128
_SUBLANE = 8


# ----------------------------- kernels --------------------------------------


def _check_loss_none_kernel(out_ref, tgt_ref, tau_ref, loss_ref):
    """Elementwise check loss. Blocks: (1, C, S, 128); tau (1, 1, S, 128)."""
    err = tgt_ref[...].astype(jnp.float32) - out_ref[...].astype(jnp.float32)
    tau = tau_ref[...].astype(jnp.float32)          # broadcasts over major C axis
    # tau*err - min(err, 0) == where(err >= 0, tau*err, (tau-1)*err)
    loss_ref[...] = (tau * err - jnp.minimum(err, 0.0)).astype(loss_ref.dtype)


def _check_loss_reduce_kernel(out_ref, tgt_ref, tau_ref, partial_ref, acc_ref):
    """Per-(batch, chunk) partial sums of the check loss.

    grid = (B, n_chunks, n_inner); the innermost axis is the reduction
    ("arbitrary") axis. acc_ref is a (1, 1, S, 128) f32 accumulator: the hot loop
    is pure elementwise VALU work (channel sum folded into the accumulate); the
    sublane (XLU) reduction runs once per (b, chunk) in the epilogue and the
    remaining 128 lane-partials are summed in the wrapper.
    """
    inner = pl.program_id(2)

    @pl.when(inner == 0)
    def _():
        acc_ref[...] = jnp.zeros_like(acc_ref)

    err = tgt_ref[...].astype(jnp.float32) - out_ref[...].astype(jnp.float32)
    tau = tau_ref[...].astype(jnp.float32)          # (1, 1, S, 128)
    val = tau * err - jnp.minimum(err, 0.0)         # (1, C, S, 128)
    acc_ref[...] += jnp.sum(val, axis=1, keepdims=True)

    @pl.when(inner == pl.num_programs(2) - 1)
    def _():
        partial_ref[...] = jnp.sum(acc_ref[...], axis=2)   # (1, 1, 128) lane partials


# ----------------------------- sizing helpers --------------------------------


def _generation_params():
    """(target_block_bytes_per_input, vmem_limit_bytes) from the chip's VMEM size."""
    try:
        vmem_cap = int(pltpu.get_tpu_info().vmem_capacity_bytes)
    except Exception:
        vmem_cap = 64 * 1024 * 1024
    if vmem_cap >= 100 * 1024 * 1024:           # v5e / v6e: 128 MiB VMEM per core
        return 8 * 1024 * 1024, 64 * 1024 * 1024
    return 4 * 1024 * 1024, 44 * 1024 * 1024    # v7x (64 MiB per TC) or unknown


def _largest_sublane_tile(nl, cap):
    """Largest S dividing nl with S % 8 == 0 and S <= cap; None if none exists."""
    s = (min(nl, cap) // _SUBLANE) * _SUBLANE
    while s >= _SUBLANE:
        if nl % s == 0:
            return s
        s -= _SUBLANE
    return None


def _layout_hw(hw, cap):
    """Pick (hw_pad, nl, S): hw_pad % 128 == 0, S | nl, S % 8 == 0 or S == nl."""
    hw_pad = -(-hw // _LANE) * _LANE
    nl = hw_pad // _LANE
    s = _largest_sublane_tile(nl, cap)
    if s is not None:
        return hw_pad, nl, s
    if nl <= cap:
        return hw_pad, nl, nl                   # full-extent second-minor dim
    # Re-pad so nl becomes a multiple of 8 and an 8-divisor always exists.
    hw_pad = -(-hw // (_SUBLANE * _LANE)) * (_SUBLANE * _LANE)
    nl = hw_pad // _LANE
    return hw_pad, nl, _largest_sublane_tile(nl, cap)


def _choose_chunks(n_blk, b, min_parallel=8, max_chunks=64):
    """Split the reduction range so B * n_chunks >= min_parallel when possible
    (keeps both v7x TensorCores busy for small B). n_chunks always divides n_blk."""
    if n_blk <= 1 or b >= min_parallel:
        return 1
    want = -(-min_parallel // b)
    best = 1
    for d in range(1, min(n_blk, max_chunks) + 1):
        if n_blk % d == 0:
            best = d
            if d >= want:
                break
    return best


# ----------------------------- wrapper ---------------------------------------


def randomized_check_loss(output, target, tau, reduction="mean"):
    """Pallas-backed RandomizedCheckLoss.forward.

    output, target: [B, C, H, W]
    tau:            [B, 1, H, W] (or broadcastable to it); broadcast over C
    """
    B, C, H, W = output.shape
    assert target.shape == (B, C, H, W)
    tau = jnp.broadcast_to(tau, (B, 1, H, W))
    HW = H * W

    out_isz = jnp.dtype(output.dtype).itemsize
    tgt_isz = jnp.dtype(target.dtype).itemsize
    tau_isz = jnp.dtype(tau.dtype).itemsize
    res_dtype = jnp.result_type(output.dtype, target.dtype, tau.dtype)
    res_isz = jnp.dtype(res_dtype).itemsize

    is_none = reduction == "none"
    if reduction == "mean":
        scale = 1.0 / float(B * C * HW)
    elif reduction == "sum":
        scale = 1.0
    elif not is_none:
        raise ValueError(f"Invalid reduction type: {reduction}")

    target_block_bytes, vmem_limit = _generation_params()

    # Double-buffered residency per unit of S (bytes), plus non-pipelined scratch.
    per_s = 2 * (C * _LANE * out_isz + C * _LANE * tgt_isz + _LANE * tau_isz)
    if is_none:
        per_s += 2 * C * _LANE * res_isz        # pipelined output stream
    else:
        per_s += _LANE * 4                      # f32 accumulator scratch
    cap = max(_SUBLANE,
              min(target_block_bytes // max(1, C * _LANE * max(out_isz, tgt_isz)),
                  max(1, int(0.8 * vmem_limit) // per_s)))

    HW_pad, nl, S = _layout_hw(HW, cap)
    n_blk = nl // S

    # Lane-dense (.., nl, 128) layout: free reshape for contiguous NCHW inputs; the
    # pad (a copy) only happens when H*W is not a multiple of 128.
    # TODO(synk): if inputs arrive non-contiguous (e.g. channels-last), tile 4-D
    # (1, C, Ht, W) blocks directly instead of reshaping to avoid a hidden copy.
    def to_tiles(x, c):
        x = x.reshape(B, c, HW)
        if HW_pad != HW:
            x = jnp.pad(x, ((0, 0), (0, 0), (0, HW_pad - HW)))
        return x.reshape(B, c, nl, _LANE)

    out4 = to_tiles(output, C)
    tgt4 = to_tiles(target, C)
    tau4 = to_tiles(tau, 1)

    in_bytes = out4.size * out_isz + tgt4.size * tgt_isz + tau4.size * tau_isz
    elem_count = B * C * HW_pad

    if is_none:
        io_spec = pl.BlockSpec((1, C, S, _LANE), lambda b, j: (b, 0, j, 0))
        tau_spec = pl.BlockSpec((1, 1, S, _LANE), lambda b, j: (b, 0, j, 0))
        loss = pl.pallas_call(
            _check_loss_none_kernel,
            out_shape=jax.ShapeDtypeStruct((B, C, nl, _LANE), res_dtype),
            grid_spec=pltpu.PrefetchScalarGridSpec(
                num_scalar_prefetch=0,
                grid=(B, n_blk),
                in_specs=[io_spec, io_spec, tau_spec],
                out_specs=pl.BlockSpec((1, C, S, _LANE), lambda b, j: (b, 0, j, 0)),
            ),
            compiler_params=pltpu.CompilerParams(
                dimension_semantics=("parallel", "parallel"),
                vmem_limit_bytes=vmem_limit),
            cost_estimate=pl.CostEstimate(
                flops=3 * elem_count, transcendentals=0,
                bytes_accessed=in_bytes + elem_count * res_isz),
        )(out4, tgt4, tau4)
        loss = loss.reshape(B, C, HW_pad)
        if HW_pad != HW:
            loss = loss[:, :, :HW]
        return loss.reshape(B, C, H, W)

    # ---- mean / sum: per-(batch, chunk) partial sums, chunk axis also parallel ----
    n_chunks = _choose_chunks(n_blk, B)
    n_inner = n_blk // n_chunks

    io_spec = pl.BlockSpec((1, C, S, _LANE),
                           lambda b, ch, j: (b, 0, ch * n_inner + j, 0))
    tau_spec = pl.BlockSpec((1, 1, S, _LANE),
                            lambda b, ch, j: (b, 0, ch * n_inner + j, 0))
    part_spec = pl.BlockSpec((1, 1, _LANE),
                             lambda b, ch, j: (b * n_chunks + ch, 0, 0))

    partials = pl.pallas_call(
        _check_loss_reduce_kernel,
        out_shape=jax.ShapeDtypeStruct((B * n_chunks, 1, _LANE), jnp.float32),
        grid_spec=pltpu.PrefetchScalarGridSpec(
            num_scalar_prefetch=0,
            grid=(B, n_chunks, n_inner),
            in_specs=[io_spec, io_spec, tau_spec],
            out_specs=part_spec,
            scratch_shapes=[pltpu.VMEM((1, 1, S, _LANE), jnp.float32)]),
        compiler_params=pltpu.CompilerParams(
            dimension_semantics=("parallel", "parallel", "arbitrary"),
            vmem_limit_bytes=vmem_limit),
        cost_estimate=pl.CostEstimate(
            flops=4 * elem_count, transcendentals=0,
            bytes_accessed=in_bytes + B * n_chunks * _LANE * 4),
    )(out4, tgt4, tau4)

    total = jnp.sum(partials, dtype=jnp.float32) * jnp.float32(scale)
    return total.astype(res_dtype)


# ----------------------------- reference + main -------------------------------


def _reference(output, target, tau, reduction="mean"):
    err = target - output
    loss = jnp.where(err >= 0, tau * err, (tau - 1.0) * err)
    if reduction == "none":
        return loss
    if reduction == "mean":
        return loss.mean()
    return loss.sum()


if __name__ == "__main__":
    B, C, H, W = 2, 4, 16, 16
    key = jax.random.PRNGKey(0)
    k1, k2, k3 = jax.random.split(key, 3)

    output = jax.random.normal(k1, (B, C, H, W), dtype=jnp.float32)
    target = jax.random.normal(k2, (B, C, H, W), dtype=jnp.float32)
    tau = jax.random.uniform(k3, (B, 1, H, W), dtype=jnp.float32)

    # mean (default reduction)
    loss_mean = jax.block_until_ready(
        randomized_check_loss(output, target, tau, reduction="mean"))
    ref_mean = _reference(output, target, tau, reduction="mean")
    assert jnp.allclose(loss_mean, ref_mean, rtol=1e-5, atol=1e-5), (
        loss_mean, ref_mean)

    # sum
    loss_sum = jax.block_until_ready(
        randomized_check_loss(output, target, tau, reduction="sum"))
    ref_sum = _reference(output, target, tau, reduction="sum")
    assert jnp.allclose(loss_sum, ref_sum, rtol=1e-5, atol=1e-4), (
        loss_sum, ref_sum)

    # none
    loss_none = jax.block_until_ready(
        randomized_check_loss(output, target, tau, reduction="none"))
    ref_none = _reference(output, target, tau, reduction="none")
    assert jnp.allclose(loss_none, ref_none, rtol=1e-5, atol=1e-5)

    print("KERNEL_OK")
</pallas_src>

<mosaic_0001>
module attributes {stable_mosaic.version = 11 : i64} {
  func.func @_check_loss_reduce_kernel(%arg0: i32, %arg1: i32, %arg2: i32, %arg3: memref<1x4x2x128xf32, #tpu.memory_space<vmem>>, %arg4: memref<1x4x2x128xf32, #tpu.memory_space<vmem>>, %arg5: memref<1x1x2x128xf32, #tpu.memory_space<vmem>>, %arg6: memref<1x1x128xf32, #tpu.memory_space<vmem>>, %arg7: memref<1x1x2x128xf32, #tpu.memory_space<vmem>>) attributes {dimension_semantics = [#tpu.dimension_semantics<parallel>, #tpu.dimension_semantics<parallel>, #tpu.dimension_semantics<arbitrary>], iteration_bounds = array<i64: 2, 1, 1>, scalar_prefetch = 0 : i64, scratch_operands = 1 : i64, tpu.core_type = #tpu.core_type<tc>, window_params = [{transform_indices = @transform_0, window_bounds = array<i64: 1, 4, 2, 128>}, {transform_indices = @transform_1, window_bounds = array<i64: 1, 4, 2, 128>}, {transform_indices = @transform_2, window_bounds = array<i64: 1, 1, 2, 128>}, {transform_indices = @transform_3, window_bounds = array<i64: 1, 1, 128>}]} {
    %c0_i32 = arith.constant 0 : i32
    %0 = arith.cmpi eq, %arg2, %c0_i32 : i32
    %1 = arith.extui %0 : i1 to i32
    %c0_i32_0 = arith.constant 0 : i32
    %2 = arith.cmpi ne, %1, %c0_i32_0 : i32
    scf.if %2 {
      %cst_23 = arith.constant 0.000000e+00 : f32
      %20 = vector.broadcast %cst_23 : f32 to vector<1x1x2x128xf32>
      %c0_24 = arith.constant 0 : index
      %c0_25 = arith.constant 0 : index
      %c0_26 = arith.constant 0 : index
      %c0_27 = arith.constant 0 : index
      %21 = vector.load %arg7[%c0_24, %c0_25, %c0_26, %c0_27] : memref<1x1x2x128xf32, #tpu.memory_space<vmem>>, vector<1x1x2x128xf32>
      tpu.vector_store %arg7[%c0_24, %c0_25, %c0_26, %c0_27], %20 {strides = array<i32>} : memref<1x1x2x128xf32, #tpu.memory_space<vmem>>, vector<1x1x2x128xf32>,
    } else {
    }
    %c0 = arith.constant 0 : index
    %c0_1 = arith.constant 0 : index
    %c0_2 = arith.constant 0 : index
    %c0_3 = arith.constant 0 : index
    %3 = vector.load %arg4[%c0, %c0_1, %c0_2, %c0_3] : memref<1x4x2x128xf32, #tpu.memory_space<vmem>>, vector<1x4x2x128xf32>
    %c0_4 = arith.constant 0 : index
    %c0_5 = arith.constant 0 : index
    %c0_6 = arith.constant 0 : index
    %c0_7 = arith.constant 0 : index
    %4 = vector.load %arg3[%c0_4, %c0_5, %c0_6, %c0_7] : memref<1x4x2x128xf32, #tpu.memory_space<vmem>>, vector<1x4x2x128xf32>
    %5 = arith.subf %3, %4 : vector<1x4x2x128xf32>
    %c0_8 = arith.constant 0 : index
    %c0_9 = arith.constant 0 : index
    %c0_10 = arith.constant 0 : index
    %c0_11 = arith.constant 0 : index
    %6 = vector.load %arg5[%c0_8, %c0_9, %c0_10, %c0_11] : memref<1x1x2x128xf32, #tpu.memory_space<vmem>>, vector<1x1x2x128xf32>
    %7 = vector.broadcast %6 : vector<1x1x2x128xf32> to vector<1x4x2x128xf32>
    %8 = arith.mulf %7, %5 : vector<1x4x2x128xf32>
    %cst = arith.constant 0.000000e+00 : f32
    %9 = vector.broadcast %cst : f32 to vector<1x4x2x128xf32>
    %10 = arith.minimumf %5, %9 : vector<1x4x2x128xf32>
    %11 = arith.subf %8, %10 : vector<1x4x2x128xf32>
    %c0_12 = arith.constant 0 : index
    %c0_13 = arith.constant 0 : index
    %c0_14 = arith.constant 0 : index
    %c0_15 = arith.constant 0 : index
    %12 = vector.load %arg7[%c0_12, %c0_13, %c0_14, %c0_15] : memref<1x1x2x128xf32, #tpu.memory_space<vmem>>, vector<1x1x2x128xf32>
    %cst_16 = arith.constant dense<0.000000e+00> : vector<1x2x128xf32>
    %13 = vector.multi_reduction <add>, %11, %cst_16 [1] : vector<1x4x2x128xf32> to vector<1x2x128xf32>
    %14 = vector.shape_cast %13 : vector<1x2x128xf32> to vector<1x1x2x128xf32>
    %15 = arith.addf %12, %14 : vector<1x1x2x128xf32>
    %c0_17 = arith.constant 0 : index
    %c0_18 = arith.constant 0 : index
    %c0_19 = arith.constant 0 : index
    %c0_20 = arith.constant 0 : index
    %16 = vector.load %arg7[%c0_17, %c0_18, %c0_19, %c0_20] : memref<1x1x2x128xf32, #tpu.memory_space<vmem>>, vector<1x1x2x128xf32>
    tpu.vector_store %arg7[%c0_17, %c0_18, %c0_19, %c0_20], %15 {strides = array<i32>} : memref<1x1x2x128xf32, #tpu.memory_space<vmem>>, vector<1x1x2x128xf32>,
    %c0_i32_21 = arith.constant 0 : i32
    %17 = arith.cmpi eq, %arg2, %c0_i32_21 : i32
    %18 = arith.extui %17 : i1 to i32
    %c0_i32_22 = arith.constant 0 : i32
    %19 = arith.cmpi ne, %18, %c0_i32_22 : i32
    scf.if %19 {
      %c0_23 = arith.constant 0 : index
      %c0_24 = arith.constant 0 : index
      %c0_25 = arith.constant 0 : index
      %c0_26 = arith.constant 0 : index
      %20 = vector.load %arg7[%c0_23, %c0_24, %c0_25, %c0_26] : memref<1x1x2x128xf32, #tpu.memory_space<vmem>>, vector<1x1x2x128xf32>
      %cst_27 = arith.constant dense<0.000000e+00> : vector<1x1x128xf32>
      %21 = vector.multi_reduction <add>, %20, %cst_27 [2] : vector<1x1x2x128xf32> to vector<1x1x128xf32>
      %c0_28 = arith.constant 0 : index
      %c0_29 = arith.constant 0 : index
      %c0_30 = arith.constant 0 : index
      %22 = vector.load %arg6[%c0_28, %c0_29, %c0_30] : memref<1x1x128xf32, #tpu.memory_space<vmem>>, vector<1x1x128xf32>
      tpu.vector_store %arg6[%c0_28, %c0_29, %c0_30], %21 {strides = array<i32>} : memref<1x1x128xf32, #tpu.memory_space<vmem>>, vector<1x1x128xf32>,
    } else {
    }
    return
  }
  func.func @transform_0(%arg0: i32, %arg1: i32, %arg2: i32) -> (i32, i32, i32, i32) {
    %c1_i32 = arith.constant 1 : i32
    %0 = arith.muli %arg1, %c1_i32 : i32
    %1 = arith.addi %0, %arg2 : i32
    %c0_i32 = arith.constant 0 : i32
    %c0_i32_0 = arith.constant 0 : i32
    %c0_i32_1 = arith.constant 0 : i32
    return %arg0, %c0_i32, %1, %c0_i32_0 : i32, i32, i32, i32
  }
  func.func @transform_1(%arg0: i32, %arg1: i32, %arg2: i32) -> (i32, i32, i32, i32) {
    %c1_i32 = arith.constant 1 : i32
    %0 = arith.muli %arg1, %c1_i32 : i32
    %1 = arith.addi %0, %arg2 : i32
    %c0_i32 = arith.constant 0 : i32
    %c0_i32_0 = arith.constant 0 : i32
    %c0_i32_1 = arith.constant 0 : i32
    return %arg0, %c0_i32, %1, %c0_i32_0 : i32, i32, i32, i32
  }
  func.func @transform_2(%arg0: i32, %arg1: i32, %arg2: i32) -> (i32, i32, i32, i32) {
    %c1_i32 = arith.constant 1 : i32
    %0 = arith.muli %arg1, %c1_i32 : i32
    %1 = arith.addi %0, %arg2 : i32
    %c0_i32 = arith.constant 0 : i32
    %c0_i32_0 = arith.constant 0 : i32
    %c0_i32_1 = arith.constant 0 : i32
    return %arg0, %c0_i32, %1, %c0_i32_0 : i32, i32, i32, i32
  }
  func.func @transform_3(%arg0: i32, %arg1: i32, %arg2: i32) -> (i32, i32, i32) {
    %c1_i32 = arith.constant 1 : i32
    %0 = arith.muli %arg0, %c1_i32 : i32
    %1 = arith.addi %0, %arg1 : i32
    %c0_i32 = arith.constant 0 : i32
    %c0_i32_0 = arith.constant 0 : i32
    %c0_i32_1 = arith.constant 0 : i32
    return %1, %c0_i32, %c0_i32_0 : i32, i32, i32
  }
}

</mosaic_0001>

<bundles_post_ra>
// kernel: tpu_custom_call.1
= control target key start
LH: loop header
LB: loop body
LE: loop exit
PB: predicated region body
PF: predicated region fallthrough
CT: control target
= control target key end

     0   :  { %8 = vsyncpa [#allocation4], 0  ;;  %s996_s0 = inlined_call_operand.hbm [shape: f32[2,4,2,128], index: 0, kind: input, shape index: {}]   ;;  %s997_s1 = inlined_call_operand.hbm [shape: f32[2,4,2,128], index: 1, kind: input, shape index: {}]   ;;  %s998_s2 = inlined_call_operand.vmem [shape: f32[2,1,2,128], index: 2, kind: input, shape index: {}]   ;;  %s999_s3 = inlined_call_operand.hbm [shape: f32[2,1,128], index: 3, kind: output, shape index: {}]  }
   0x1   :  { %10 = vsyncpa [#allocation4 + $0x1], 0 }
   0x2   :  { %11 = vsyncpa [#allocation7], 0 }
   0x3   :  { %13 = vsyncpa [#allocation7 + $0x1], 0 }
   0x4   :  { %14 = vsyncpa [#allocation5], 0 }
   0x5   :  { %16 = vsyncpa [#allocation5 + $0x1], 0  ;;  %s751_s12 = smov 0   ;;  %s753_s13 = smov 0  }
   0x6   :  { %s755_s14 = smov 0   ;;  %s757_s15 = smov 0  }
   0x7   :  { %s759_s16 = smov 0   ;;  %s761_s17 = smov 0  }
   0x8 LB: > { %s488_s18 = sadd.s32 4294967295, %s723_s17   ;;  %s489_s19 = sadd.s32 4294967294, %s723_s17   ;;  %s723_s17 = sphi %s761_s17, %s22_s17   ;;  %s719_s16 = sphi %s759_s16, %s1017_s16   ;;  %s715_s15 = sphi %s757_s15, %s1016_s15   ;;  %s711_s14 = sphi %s755_s14, %s1015_s14   ;;  %s707_s13 = sphi %s753_s13, %s1014_s13   ;;  %s703_s12 = sphi %s751_s12, %s1013_s12  }
   0x9   : > { %s41_s20 = sadd.s32 1, %s719_s16  ;;  %s52_s21 = sadd.s32 1, %s711_s14 }
   0xa   : > { %p43_p0 = scmp.ge.s32.totalorder %s41_s20, 2  ;;  %p59_p1 = scmp.ne.s32.totalorder %s711_s14, %s707_s13 }
   0xb   : > { %p60_p2 = scmp.eq.s32.totalorder %s723_s17, 0  ;;  %p65_p3 = scmp.ne.s32.totalorder %s707_s13, %s703_s12 }
   0xc   : > { %s1019_s20 = smov (%p43_p0, %s41_s20), 0  ;;  %p66_p5 = scmp.eq.s32.totalorder %s488_s18, 0 }
   0xd   : > { %p792_p4 = por %p60_p2, %p59_p1  ;;  %s47_s23 = ssub.s32 %s719_s16, %s1019_s20 }
   0xe   : > { %p151_p6 = scmp.eq.s32.totalorder %s488_s18, 1  ;;  %p50_p7 = scmp.eq.s32.totalorder %s47_s23, 0 }
   0xf   : > { %p798_p8 = por %p66_p5, %p65_p3  ;;  %p157_p10 = scmp.eq.s32.totalorder %s489_s19, 1 }
  0x10   : > { %p802_p9 = por %p151_p6, %p59_p1  ;;  %p524_p13 = scmp.lt.s32.totalorder %s723_s17, 2 }
  0x11   : > { %s1003_s24 = scalar_select %p798_p8, 1, 0 }
  0x12   : > { %s1004_s25 = scalar_select %p802_p9, 1, 0 }
  0x13   : > { %s807_s26 = scalar_select %p50_p7, %s711_s14, %s52_s21  }
  0x14   : > { %p809_p11 = por %p157_p10, %p65_p3  ;;  %s816_s28 = sand.u32 1, %s711_s14  }
  0x15   : > { %s492_s29 = sshll.u32 %s816_s28, 3  ;;  %s505_s30 = sshll.u32 %s719_s16, 7 }
  0x16   : > { %s1005_s27 = scalar_select %p809_p11, 1, 0 }
  0x17   : > { %s825_s6 = scalar_lea.hbm %s996_s0, %s505_s30  ;;  %s181_s7 = scalar_lea.vmem [#allocation3], %s492_s29 }
  0x18   : > { %s190_s8 = sshll.u32 %s181_s7, 4  ;;  %p833_p0 = pnand %p524_p13, %p792_p4  ;;  %s829_s8 = int_to_ptr.vmem [resolvable:$true] %s190_s8 }
  0x19   : > { %s178_s10 = scalar_lea.sflag [#allocation4], %s816_s28  ;;  %s577_s11 = scalar_lea.hbm %s825_s6, 128 }
  0x1a   : > { %p578_p2 = scmp.ne.s32.totalorder %s825_s6, %s577_s11  ;;  %p579_p3 = pneg %p833_p0 }
  0x1b   : > { %s582_s21 = scalar_lea.hbm %s996_s0, 256  ;;  %p583_p4 = scmp.lt.u32.totalorder %s825_s6, %s996_s0 }
  0x1c   : > { %p580_p5 = pnand %p579_p3, %p578_p2  ;;  %p584_p7 = scmp.lt.u32.totalorder %s582_s21, %s577_s11 }
  0x1d   : > { %p586_p13 = scmp.lt.u32.totalorder %s577_s11, %s825_s6 }
  0x1e   : > { %p581_p6 = pneg %p580_p5  ;;  %p585_p10 = por %p584_p7, %p583_p4 }
  0x20   : > { %p587_p12 = por %p586_p13, %p585_p10 }
  0x22   : > { %p588_p1 = pnand %p587_p12, %p581_p6 }
  0x24   : > { %591 = shalt.err (!%p588_p1)
}
  0x25   : > { %s592_s4 = scalar_lea.vmem %s829_s8, 128  ;;  %s725_s5 = smov [#allocation3]  }
  0x26   : > { %p593_p2 = scmp.ne.s32.totalorder %s829_s8, %s592_s4  ;;  %s597_s7 = sshll.u32 %s725_s5, 4  ;;  %s598_s7 = int_to_ptr.vmem [resolvable:$false] %s597_s7 }
  0x27   : > { %s599_s18 = scalar_lea.vmem %s598_s7, 256  ;;  %p600_p9 = scmp.lt.s32.totalorder %s829_s8, %s598_s7 }
  0x28   : > { %p595_p5 = pnand %p593_p2, %p579_p3  ;;  %p601_p4 = scmp.lt.s32.totalorder %s599_s18, %s592_s4 }
  0x2a   : > { %p596_p11 = pneg %p595_p5  ;;  %p602_p7 = por %p601_p4, %p600_p9 }
  0x2c   : > { %p603_p10 = pnand %p602_p7, %p596_p11 }
  0x2e   : > { %606 = shalt.err (!%p603_p10)
}
  0x2f   : > { %s726_s11 = smov 32   ;;  %s727_s19 = smov 2  }
  0x30   : > { %516 = dma.hbm_to_vmem [thread:$0]  (!%p833_p0), %s825_s6, 128, %s829_s8, %s178_s10, %s726_s11, %s726_s11, %s727_s19  }
  0x31   : > { %p233_p9 = scmp.lt.s32.totalorder %s723_s17, 3  ;;  %s875_s23 = scalar_lea.hbm %s997_s1, %s505_s30 }
  0x32   : > { %p1007_p11 = scmp.ge.s32.totalorder %s723_s17, 1  ;;  %s204_s5 = scalar_lea.vmem [#allocation6], %s492_s29 }
  0x33   : > { %s213_s7 = sshll.u32 %s204_s5, 4  ;;  %s201_s6 = scalar_lea.sflag [#allocation7], %s816_s28  ;;  %s885_s7 = int_to_ptr.vmem [resolvable:$true] %s213_s7 }
  0x34   : > { %p879_p12 = pnand %p1007_p11, %p233_p9  ;;  %s607_s8 = scalar_lea.hbm %s875_s23, 128 }
  0x35   : > { %p608_p1 = scmp.ne.s32.totalorder %s875_s23, %s607_s8  ;;  %s612_s18 = scalar_lea.hbm %s997_s1, 256 }
  0x36   : > { %p613_p2 = scmp.lt.u32.totalorder %s875_s23, %s997_s1  ;;  %p614_p5 = scmp.lt.u32.totalorder %s612_s18, %s607_s8 }
  0x37   : > { %p610_p6 = pnand %p608_p1, %p579_p3  ;;  %p616_p7 = scmp.lt.u32.totalorder %s607_s8, %s875_s23 }
  0x38   : > { %p615_p4 = por %p614_p5, %p613_p2 }
  0x39   : > { %p611_p13 = pneg %p610_p6 }
  0x3a   : > { %p617_p10 = por %p616_p7, %p615_p4 }
  0x3c   : > { %p618_p9 = pnand %p617_p10, %p611_p13 }
  0x3e   : > { %621 = shalt.err (!%p618_p9)
}
  0x3f   : > { %s622_s29 = scalar_lea.vmem %s885_s7, 128  ;;  %s728_s5 = smov [#allocation6]  }
  0x40   : > { %p623_p11 = scmp.ne.s32.totalorder %s885_s7, %s622_s29  ;;  %s627_s30 = sshll.u32 %s728_s5, 4  ;;  %s628_s30 = int_to_ptr.vmem [resolvable:$false] %s627_s30 }
  0x41   : > { %s629_s10 = scalar_lea.vmem %s628_s30, 256  ;;  %p630_p8 = scmp.lt.s32.totalorder %s885_s7, %s628_s30 }
  0x42   : > { %p625_p1 = pnand %p623_p11, %p579_p3  ;;  %p631_p2 = scmp.lt.s32.totalorder %s629_s10, %s622_s29 }
  0x44   : > { %p626_p6 = pneg %p625_p1  ;;  %p632_p5 = por %p631_p2, %p630_p8 }
  0x46   : > { %p633_p4 = pnand %p632_p5, %p626_p6 }
  0x48   : > { %636 = shalt.err (!%p633_p4)
}
  0x49   : > { %519 = dma.hbm_to_vmem [thread:$0]  (!%p833_p0), %s875_s23, 128, %s885_s7, %s201_s6, %s726_s11, %s726_s11, %s727_s19  }
  0x4a   : > { %237 = sbr.rel (%p879_p12) target bundleno = 139 (0x8b), region = 32  ;;  %s919_s8 = sand.u32 (!%p879_p12), 1, %s707_s13  }
  0x4b   : > { %s499_s18 = sshll.u32 (!%p879_p12), %s919_s8, 3  ;;  %s240_s21 = scalar_lea.sflag (!%p879_p12), [#allocation4], %s919_s8 }
  0x4c   : > { %s243_s9 = scalar_lea.vmem (!%p879_p12), [#allocation3], %s499_s18  ;;  %p1009_p8 = scmp.ne.s32.totalorder (!%p879_p12), %s1003_s24, 0 }
  0x51   : > { %690 = dma.done.wait (%p1009_p8), %s240_s21, 128  }
  0x52   : > { %692 = vsyncadd (%p1009_p8), %s240_s21, 4294967168  ;;  %s249_s28 = scalar_lea.sflag [#allocation7], %s919_s8  ;;  %s252_s11 = scalar_lea.vmem [#allocation6], %s499_s18 }
  0x53   : > { %694 = dma.done.wait (%p1009_p8), %s249_s28, 128  }
  0x54   : > { %696 = vsyncadd (%p1009_p8), %s249_s28, 4294967168  ;;  %p290_p0 = scmp.lt.s32.totalorder %s715_s15, 1  ;;  %v729_v0 = vmov 0.0   ;;  %v304_v1 = vld [vmem:[%s252_s11] sm:$0x3]  ;;  %vm330_vm0 = vcmask 1041408  }
  0x55   : > { %303 = vst [vmem:[#allocation2] sm:$0x3] %v729_v0  ;;  %v305_v2 = vld [vmem:[%s252_s11 + $0x2] sm:$0x3]  ;;  %v306_v3 = vld [vmem:[%s252_s11 + $0x4] sm:$0x3] }
  0x56   : > { %s291_s19 = scalar_select %p290_p0, %s715_s15, 1  ;;  %v307_v4 = vld [vmem:[%s252_s11 + $0x6] sm:$0x3]  ;;  %v308_v5 = vld [vmem:[%s243_s9] sm:$0x3] }
  0x57   : > { %v309_v6 = vld [vmem:[%s243_s9 + $0x2] sm:$0x3]  ;;  %v310_v7 = vld [vmem:[%s243_s9 + $0x4] sm:$0x3]  ;;  %v311_v8 = vld [vmem:[%s243_s9 + $0x6] sm:$0x3]  ;;  %v312_v9 = vsub.f32 %v304_v1, %v308_v5 }
  0x58   : > { %s501_s23 = sshll.u32 %s291_s19, 1  ;;  %v313_v10 = vsub.f32 %v305_v2, %v309_v6  ;;  %v314_v12 = vsub.f32 %v306_v3, %v310_v7  ;;  %v315_v13 = vsub.f32 %v307_v4, %v311_v8  ;;  %s286_s24 = scalar_lea.vmem [#allocation8], %s919_s8 }
  0x59   : > { %s296_s6 = scalar_lea.vmem %s998_s2, %s501_s23  ;;  %v321_v16 = vmin.f32 %v312_v9, 0.0  ;;  %s366_s22 = sshll.u32 %s286_s24, 4  ;;  %s944_s22 = int_to_ptr.vmem [resolvable:$true] %s366_s22 }
  0x5a   : > { %v316_v11 = vld [vmem:[%s296_s6] sm:$0x3]  ;;  %v322_v17 = vmin.f32 %v313_v10, 0.0  ;;  %v323_v20 = vmin.f32 %v314_v12, 0.0  ;;  %v324_v21 = vmin.f32 %v315_v13, 0.0  ;;  %s502_s29 = sshll.u32 %s715_s15, 4 }
  0x5b   : > { %v317_v14 = vmul.f32 %v316_v11, %v312_v9  ;;  %v318_v15 = vmul.f32 %v316_v11, %v313_v10  ;;  %v319_v18 = vmul.f32 %v316_v11, %v314_v12  ;;  %v320_v19 = vmul.f32 %v316_v11, %v315_v13  ;;  %s949_s10 = scalar_lea.hbm %s999_s3, %s502_s29  ;;  %s353_s18 = scalar_lea.sflag [#allocation5], %s919_s8 }
  0x5c   : > { %v329_v32 = vld [vmem:[#allocation2] sm:$0x3]  ;;  %s637_s21 = scalar_lea.vmem %s944_s22, 16  ;;  %p1010_p12 = scmp.ne.s32.totalorder %s1004_s25, 0 }
  0x5d   : > { %v325_v22 = vsub.f32 %v317_v14, %v321_v16  ;;  %v326_v23 = vsub.f32 %v318_v15, %v322_v17  ;;  %v327_v24 = vsub.f32 %v319_v18, %v323_v20  ;;  %v328_v25 = vsub.f32 %v320_v19, %v324_v21  ;;  %p638_p3 = scmp.ne.s32.totalorder %s944_s22, %s637_s21  ;;  %s730_s15 = smov [#allocation8]  }
  0x5e   : > { %s641_s9 = sshll.u32 %s730_s15, 4  ;;  %s642_s9 = int_to_ptr.vmem [resolvable:$false] %s641_s9 }
  0x5f   : > { %v331_v26 = vsel %vm330_vm0, %v325_v22, 0.0  ;;  %v332_v27 = vsel %vm330_vm0, %v326_v23, 0.0  ;;  %v334_v29 = vsel %vm330_vm0, %v327_v24, 0.0  ;;  %v336_v30 = vsel %vm330_vm0, %v328_v25, 0.0  ;;  %p639_p13 = pnand %p638_p3, %p1010_p12  ;;  %s643_s28 = scalar_lea.vmem %s642_s9, 32 }
  0x60   : > { %v333_v28 = vadd.f32 %v332_v27, %v331_v26  ;;  %p644_p10 = scmp.lt.s32.totalorder %s944_s22, %s642_s9  ;;  %p645_p9 = scmp.lt.s32.totalorder %s643_s28, %s637_s21 }
  0x61   : > { %p640_p7 = pneg %p639_p13 }
  0x62   : > { %v335_v31 = vadd.f32 %v334_v29, %v333_v28  ;;  %p646_p11 = por %p645_p9, %p644_p10 }
  0x64   : > { %v337_v33 = vadd.f32 %v336_v30, %v335_v31  ;;  %p647_p1 = pnand %p646_p11, %p640_p7 }
  0x66   : > { %v338_v34 = vadd.f32 %v337_v33, %v329_v32 }
  0x68   : > { %339 = vst [vmem:[#allocation2] sm:$0x3] %v338_v34 }
  0x6f   : > { %v343_v35 = vld [vmem:[#allocation2] sm:$0x3] }
  0x70   : > { %v344_v36 = vsel %vm330_vm0, %v343_v35, 0.0 }
  0x71   : > { %v345_v37 = vrot.slane %v344_v36, 4 }
  0x73   : > { %v346_v38 = vadd.f32 %v345_v37, %v344_v36 }
  0x75   : > { %v347_v39 = vrot.slane %v346_v38, 2 }
  0x77   : > { %v348_v40 = vadd.f32 %v347_v39, %v346_v38 }
  0x79   : > { %v349_v41 = vrot.slane %v348_v40, 1 }
  0x7b   : > { %v350_v42 = vadd.f32 %v349_v41, %v348_v40 }
  0x7d   : > { %351 = vst [vmem:[%s286_s24] sm:$0x1] %v350_v42 }
  0x7e   : > { %650 = shalt.err (!%p647_p1)
}
  0x7f   : > { %s651_s8 = scalar_lea.hbm %s949_s10, 16  ;;  %s655_s23 = scalar_lea.hbm %s999_s3, 32 }
  0x80   : > { %p652_p6 = scmp.ne.s32.totalorder %s949_s10, %s651_s8  ;;  %p656_p4 = scmp.lt.u32.totalorder %s949_s10, %s999_s3 }
  0x81   : > { %p657_p8 = scmp.lt.u32.totalorder %s655_s23, %s651_s8  ;;  %p659_p3 = scmp.lt.u32.totalorder %s651_s8, %s949_s10 }
  0x82   : > { %p653_p2 = pnand %p652_p6, %p1010_p12 }
  0x83   : > { %p658_p0 = por %p657_p8, %p656_p4 }
  0x84   : > { %p654_p5 = pneg %p653_p2 }
  0x85   : > { %p660_p13 = por %p659_p3, %p658_p0 }
  0x87   : > { %p661_p7 = pnand %p660_p13, %p654_p5 }
  0x89   : > { %664 = shalt.err (!%p661_p7)
}
  0x8a   : > { %511 = dma.vmem_to_hbm [thread:$0]  (%p1010_p12), %s944_s22, 16, %s949_s10, %s353_s18  }
  0x8b PF: > { %s378_s6 = sand.u32 1, %s703_s12   ;;  %p1011_p10 = scmp.ne.s32.totalorder %s1005_s27, 0 }
  0x8c   : > { %p1012_p9 = scmp.ge.s32.totalorder %s723_s17, 2  ;;  %s379_s24 = scalar_lea.sflag [#allocation5], %s378_s6 }
  0x8e   : > { %p521_p11 = pnand %p1012_p9, %p1011_p10 }
  0x90   : > { %698 = dma.done.wait (!%p521_p11), %s379_s24, 16  }
  0x91   : > { %700 = vsyncadd (!%p521_p11), %s379_s24, 4294967280  ;;  %s22_s17 = sadd.s32 1, %s723_s17   ;;  %s1013_s12 = smov %s707_s13 }
  0x92   : > { %p19_p1 = scmp.ge.s32.totalorder %s22_s17, 4   ;;  %s1014_s13 = smov %s711_s14 }
  0x93   : > { %s1015_s14 = smov %s807_s26  ;;  %s1016_s15 = smov %s719_s16 }
  0x94   : > { %s1017_s16 = smov %s1019_s20  ;;  %21 = sbr.rel (!%p19_p1) target bundleno = 8 (0x8), region = 101 }
  0x9b   :  { %383 = vsyncpa [#allocation4], 1 }
  0x9c   :  { %385 = vsyncpa [#allocation4 + $0x1], 1 }
  0x9d   :  { %386 = vsyncpa [#allocation7], 1 }
  0x9e   :  { %388 = vsyncpa [#allocation7 + $0x1], 1 }
  0x9f   :  { %389 = vsyncpa [#allocation5], 1 }
  0xa0   :  { %391 = vsyncpa [#allocation5 + $0x1], 1 }

</bundles_post_ra>
